<compile_context>
chip_gen: v5e
topology: v5e:2x2
jax: 0.10.0
libtpu: 0.0.40
codegen_flags: <defaults>
</compile_context>

<pallas_src>
import jax
import jax.numpy as jnp
from jax.experimental import pallas as pl
from jax.experimental.pallas import tpu as pltpu

INPUT_SIZE = 5
OUTPUT_SIZE = 1

_LANE = 128


def _round_up(n, m):
    return ((n + m - 1) // m) * m


def _linear_kernel(xT_ref, w_ref, b_ref, o_ref):
    # xT_ref: (in_features, TB)  VMEM, batch on the lane axis (lane-dense)
    # w_ref : (out_features * in_features,)  SMEM scalars, row-major PyTorch weight
    # b_ref : (out_features,)                SMEM scalars
    # o_ref : (out_features, TB) VMEM, lane-dense output
    in_f = xT_ref.shape[0]
    out_f = o_ref.shape[0]
    for o in range(out_f):  # static unroll (out_f == 1 here)
        # Unrolled scalar x vector MACs on the VPU; accumulate in f32.
        acc = xT_ref[pl.ds(0, 1), :].astype(jnp.float32) * w_ref[o * in_f + 0]
        for k in range(1, in_f):
            acc = acc + xT_ref[pl.ds(k, 1), :].astype(jnp.float32) * w_ref[o * in_f + k]
        acc = acc + b_ref[o]
        o_ref[pl.ds(o, 1), :] = acc.astype(o_ref.dtype)


def stock_predictor_forward_pallas(x, weight, bias, *, max_lane_tile=32768):
    """Pallas path: y = x @ W^T + b with batch on the lane axis.

    x:      (batch, in_features)
    weight: (out_features, in_features)   (PyTorch nn.Linear convention)
    bias:   (out_features,)
    returns (batch, out_features)
    """
    batch, in_features = x.shape
    out_features = weight.shape[0]
    dtype = x.dtype

    # Lane-dense input: batch on the last (lane) axis so every vld/vst is full-width.
    xT = x.T                                             # (in_features, batch)

    # Batch tile: multiple of 128 lanes, capped at max_lane_tile.  For
    # batch > max_lane_tile the grid is >= 2, so the "parallel" axis can be split
    # across v7x's two TensorCores; for smaller batches one step suffices.
    tb = min(max_lane_tile, _round_up(batch, _LANE))
    grid = (pl.cdiv(batch, tb),)                         # ragged last block is masked

    # 6 scalars in SMEM (no VMEM streams / double-buffers for the parameters).
    w_flat = weight.reshape(-1).astype(jnp.float32)      # (out*in,)
    b_flat = bias.reshape(-1).astype(jnp.float32)        # (out,)

    yT = pl.pallas_call(
        _linear_kernel,
        out_shape=jax.ShapeDtypeStruct((out_features, batch), dtype),
        grid_spec=pltpu.PrefetchScalarGridSpec(
            num_scalar_prefetch=0,
            grid=grid,
            in_specs=[
                # x^T tiled along the batch (lane) axis; double-buffered by Pallas.
                pl.BlockSpec((in_features, tb), lambda i: (0, i)),
                # Weight / bias: whole (tiny) arrays resident in SMEM.
                pl.BlockSpec(memory_space=pltpu.MemorySpace.SMEM),
                pl.BlockSpec(memory_space=pltpu.MemorySpace.SMEM),
            ],
            out_specs=pl.BlockSpec((out_features, tb), lambda i: (0, i)),
        ),
        compiler_params=pltpu.CompilerParams(
            dimension_semantics=("parallel",),
        ),
    )(xT, w_flat, b_flat)

    if out_features == 1:
        # (1, batch) -> (batch, 1) is a pure reshape, no transpose copy.
        return yT.reshape(batch, 1)
    return yT.T


def stock_predictor_forward(x, weight, bias, *, max_lane_tile=32768,
                            min_pallas_batch=4096):
    """StockPredictor.forward: y = x @ W^T + b.

    Small batches (the model's realistic usage) take a single fused XLA op --
    a custom call + relayout can't beat that below a few thousand rows.
    """
    batch = x.shape[0]
    if batch < min_pallas_batch:
        return (x @ weight.T + bias).astype(x.dtype)
    return stock_predictor_forward_pallas(x, weight, bias,
                                          max_lane_tile=max_lane_tile)


def init_params(key, input_size, output_size, dtype=jnp.float32):
    # Mirrors nn.Linear default init: U(-1/sqrt(in), 1/sqrt(in)).
    kw, kb = jax.random.split(key)
    bound = 1.0 / (input_size ** 0.5)
    weight = jax.random.uniform(
        kw, (output_size, input_size), dtype=dtype, minval=-bound, maxval=bound
    )
    bias = jax.random.uniform(
        kb, (output_size,), dtype=dtype, minval=-bound, maxval=bound
    )
    return weight, bias


if __name__ == "__main__":
    key = jax.random.PRNGKey(0)
    k_x, k_x2, k_p = jax.random.split(key, 3)

    weight, bias = init_params(k_p, INPUT_SIZE, OUTPUT_SIZE)

    # 1) Realistic small batch: dispatcher takes the fused-XLA fast path.
    batch = 8
    x_small = jax.random.normal(k_x, (batch, INPUT_SIZE), dtype=jnp.float32)
    out_small = jax.block_until_ready(stock_predictor_forward(x_small, weight, bias))
    ref_small = x_small @ weight.T + bias
    assert out_small.shape == (batch, OUTPUT_SIZE)
    assert jnp.allclose(out_small, ref_small, atol=1e-5, rtol=1e-5)

    # 2) Exercise the Pallas kernel itself at a small multi-block batch
    #    (tb=128 -> grid=(3,) with a ragged last block).
    batch2 = 300
    x_pallas = jax.random.normal(k_x2, (batch2, INPUT_SIZE), dtype=jnp.float32)
    out_pallas = jax.block_until_ready(
        stock_predictor_forward_pallas(x_pallas, weight, bias, max_lane_tile=128)
    )
    ref_pallas = x_pallas @ weight.T + bias
    assert out_pallas.shape == (batch2, OUTPUT_SIZE)
    assert jnp.allclose(out_pallas, ref_pallas, atol=1e-5, rtol=1e-5)

    print("KERNEL_OK")
</pallas_src>

<mosaic_0001>
module attributes {stable_mosaic.version = 11 : i64} {
  func.func @_linear_kernel(%arg0: i32, %arg1: memref<5x128xf32, #tpu.memory_space<vmem>>, %arg2: memref<5xf32, #tpu.memory_space<smem>>, %arg3: memref<1xf32, #tpu.memory_space<smem>>, %arg4: memref<1x128xf32, #tpu.memory_space<vmem>>) attributes {dimension_semantics = [#tpu.dimension_semantics<parallel>], iteration_bounds = array<i64: 3>, scalar_prefetch = 0 : i64, scratch_operands = 0 : i64, tpu.core_type = #tpu.core_type<tc>, window_params = [{transform_indices = @transform_0, window_bounds = array<i64: 5, 128>}, {transform_indices = @transform_1, window_bounds = array<i64: 5>}, {transform_indices = @transform_2, window_bounds = array<i64: 1>}, {transform_indices = @transform_3, window_bounds = array<i64: 1, 128>}]} {
    %c0 = arith.constant 0 : index
    %c0_0 = arith.constant 0 : index
    %0 = vector.load %arg1[%c0, %c0_0] : memref<5x128xf32, #tpu.memory_space<vmem>>, vector<1x128xf32>
    %c0_1 = arith.constant 0 : index
    %1 = memref.load %arg2[%c0_1] : memref<5xf32, #tpu.memory_space<smem>>
    %2 = vector.broadcast %1 : f32 to vector<1x128xf32>
    %3 = arith.mulf %0, %2 : vector<1x128xf32>
    %c1 = arith.constant 1 : index
    %c0_2 = arith.constant 0 : index
    %4 = vector.load %arg1[%c1, %c0_2] : memref<5x128xf32, #tpu.memory_space<vmem>>, vector<1x128xf32>
    %c1_3 = arith.constant 1 : index
    %5 = memref.load %arg2[%c1_3] : memref<5xf32, #tpu.memory_space<smem>>
    %6 = vector.broadcast %5 : f32 to vector<1x128xf32>
    %7 = arith.mulf %4, %6 : vector<1x128xf32>
    %8 = arith.addf %3, %7 : vector<1x128xf32>
    %c2 = arith.constant 2 : index
    %c0_4 = arith.constant 0 : index
    %9 = vector.load %arg1[%c2, %c0_4] : memref<5x128xf32, #tpu.memory_space<vmem>>, vector<1x128xf32>
    %c2_5 = arith.constant 2 : index
    %10 = memref.load %arg2[%c2_5] : memref<5xf32, #tpu.memory_space<smem>>
    %11 = vector.broadcast %10 : f32 to vector<1x128xf32>
    %12 = arith.mulf %9, %11 : vector<1x128xf32>
    %13 = arith.addf %8, %12 : vector<1x128xf32>
    %c3 = arith.constant 3 : index
    %c0_6 = arith.constant 0 : index
    %14 = vector.load %arg1[%c3, %c0_6] : memref<5x128xf32, #tpu.memory_space<vmem>>, vector<1x128xf32>
    %c3_7 = arith.constant 3 : index
    %15 = memref.load %arg2[%c3_7] : memref<5xf32, #tpu.memory_space<smem>>
    %16 = vector.broadcast %15 : f32 to vector<1x128xf32>
    %17 = arith.mulf %14, %16 : vector<1x128xf32>
    %18 = arith.addf %13, %17 : vector<1x128xf32>
    %c4 = arith.constant 4 : index
    %c0_8 = arith.constant 0 : index
    %19 = vector.load %arg1[%c4, %c0_8] : memref<5x128xf32, #tpu.memory_space<vmem>>, vector<1x128xf32>
    %c4_9 = arith.constant 4 : index
    %20 = memref.load %arg2[%c4_9] : memref<5xf32, #tpu.memory_space<smem>>
    %21 = vector.broadcast %20 : f32 to vector<1x128xf32>
    %22 = arith.mulf %19, %21 : vector<1x128xf32>
    %23 = arith.addf %18, %22 : vector<1x128xf32>
    %c0_10 = arith.constant 0 : index
    %24 = memref.load %arg3[%c0_10] : memref<1xf32, #tpu.memory_space<smem>>
    %25 = vector.broadcast %24 : f32 to vector<1x128xf32>
    %26 = arith.addf %23, %25 : vector<1x128xf32>
    %c0_11 = arith.constant 0 : index
    %c0_12 = arith.constant 0 : index
    %27 = vector.load %arg4[%c0_11, %c0_12] : memref<1x128xf32, #tpu.memory_space<vmem>>, vector<1x128xf32>
    tpu.vector_store %arg4[%c0_11, %c0_12], %26 {strides = array<i32>} : memref<1x128xf32, #tpu.memory_space<vmem>>, vector<1x128xf32>,
    return
  }
  func.func @transform_0(%arg0: i32) -> (i32, i32) {
    %c0_i32 = arith.constant 0 : i32
    %c0_i32_0 = arith.constant 0 : i32
    return %c0_i32, %arg0 : i32, i32
  }
  func.func @transform_1(%arg0: i32) -> i32 {
    %c0_i32 = arith.constant 0 : i32
    %c0_i32_0 = arith.constant 0 : i32
    return %c0_i32 : i32
  }
  func.func @transform_2(%arg0: i32) -> i32 {
    %c0_i32 = arith.constant 0 : i32
    %c0_i32_0 = arith.constant 0 : i32
    return %c0_i32 : i32
  }
  func.func @transform_3(%arg0: i32) -> (i32, i32) {
    %c0_i32 = arith.constant 0 : i32
    %c0_i32_0 = arith.constant 0 : i32
    return %c0_i32, %arg0 : i32, i32
  }
}

</mosaic_0001>

<bundles_post_ra>
// kernel: tpu_custom_call.1
= control target key start
LH: loop header
LB: loop body
LE: loop exit
PB: predicated region body
PF: predicated region fallthrough
CT: control target
= control target key end

     0   :  { %s671_s0 = inlined_call_operand.hbm [shape: f32[5,300], index: 0, kind: input, shape index: {}]   ;;  %s672_s1 = inlined_call_operand.vmem [shape: f32[5], index: 1, kind: input, shape index: {}]   ;;  %s673_s2 = inlined_call_operand.<no memory space> [shape: f32[1], index: 2, kind: input, shape index: {}]   ;;  %s674_s3 = inlined_call_operand.hbm [shape: f32[1,300], index: 3, kind: output, shape index: {}]  }
   0x1   :  { %8 = sst [smem:[#allocation2]] %s673_s2 }
   0x2   :  { %9 = vsyncpa [#allocation4], 0 }
   0x3   :  { %11 = vsyncpa [#allocation4 + $0x1], 0 }
   0x4   :  { %12 = vsyncpa [#allocation6], 0 }
   0x5   :  { %13 = vsyncpa [#allocation5], 0 }
   0x6   :  { %15 = vsyncpa [#allocation5 + $0x1], 0  ;;  %s534_s14 = smov 0   ;;  %s536_s15 = smov 0  }
   0x7   :  { %s538_s16 = smov 0   ;;  %s540_s17 = smov 0  }
   0x8 LB: > { %s555_s2 = sadd.s32 4294967295, %s508_s17   ;;  %s321_s18 = sadd.s32 4294967294, %s508_s17   ;;  %s508_s17 = sphi %s540_s17, %s683_s17   ;;  %s504_s16 = sphi %s538_s16, %s682_s16   ;;  %s500_s15 = sphi %s536_s15, %s681_s15   ;;  %s496_s14 = sphi %s534_s14, %s680_s14  }
   0x9   : > { %p41_p0 = scmp.ne.s32.totalorder %s500_s15, %s496_s14  ;;  %p42_p1 = scmp.eq.s32.totalorder %s555_s2, 0 }
   0xa   : > { %p107_p2 = scmp.eq.s32.totalorder %s555_s2, 2  ;;  %p113_p3 = scmp.eq.s32.totalorder %s321_s18, 2 }
   0xb   : > { %p564_p4 = por %p42_p1, %p41_p0  ;;  %p322_p5 = scmp.ge.s32.totalorder %s508_s17, 1 }
   0xc   : > { %p569_p6 = por %p113_p3, %p41_p0  ;;  %p120_p7 = scmp.lt.s32.totalorder %s508_s17, 4 }
   0xd   : > { %s132_s23 = sshll.u32 %s672_s1, 4  ;;  %s584_s25 = sadd.s32 1, %s508_s17   ;;  %s133_s23 = int_to_ptr.vmem [resolvable:$true] %s132_s23 }
   0xe   : > { %p577_p8 = pnand %p322_p5, %p120_p7  ;;  %s25_s26 = ssub.s32 %s508_s17, %s584_s25 }
   0xf   : > { %p26_p11 = scmp.eq.s32.totalorder %s25_s26, 0  ;;  %s28_s27 = sadd.s32 1, %s504_s16 }
  0x10   : > { %p344_p9 = pneg %p577_p8  ;;  %p35_p12 = scmp.ne.s32.totalorder %s504_s16, %s500_s15 }
  0x11   : > { %s510_s28 = smov [#allocation7]   ;;  %p36_p13 = scmp.eq.s32.totalorder %s508_s17, 0 }
  0x12   : > { %p345_p10 = pnand %p344_p9, %p42_p1  ;;  %p599_p0 = por %p107_p2, %p35_p12 }
  0x13   : > { %s594_s29 = scalar_select %p26_p11, %s504_s16, %s28_s27  }
  0x14   : > { %347 = dma.vmem_to_smem (!%p345_p10), %s133_s23, 16, %s510_s28, [#allocation6]  }
  0x15   : > { %s146_s4 = sand.u32 1, %s504_s16   ;;  %p37_p3 = por %p36_p13, %p35_p12 }
  0x16   : > { %p357_p5 = scmp.lt.s32.totalorder %s508_s17, 3  ;;  %s325_s5 = sshll.u32 %s146_s4, 3 }
  0x17   : > { %s326_s6 = sshll.u32 %s508_s17, 3  ;;  %s150_s11 = scalar_lea.vmem [#allocation3], %s325_s5 }
  0x18   : > { %s154_s9 = scalar_lea.hbm %s671_s0, %s326_s6  ;;  %s158_s12 = sshll.u32 %s150_s11, 4  ;;  %s159_s12 = int_to_ptr.vmem [resolvable:$true] %s158_s12 }
  0x19   : > { %s156_s10 = sshll.u32 %s154_s9, 4  ;;  %p609_p7 = pnand %p357_p5, %p37_p3  ;;  %s157_s10 = int_to_ptr.hbm [resolvable:$true] %s156_s10 }
  0x1a   : > { %s147_s18 = scalar_lea.sflag [#allocation4], %s146_s4  ;;  %s408_s21 = sshra.s32 %s157_s10, 4  ;;  %s409_s21 = int_to_ptr.hbm [resolvable:$true] %s408_s21 }
  0x1b   : > { %s410_s22 = scalar_lea.hbm %s409_s21, 8  ;;  %p412_p9 = pneg %p609_p7 }
  0x1c   : > { %p411_p2 = scmp.ne.s32.totalorder %s409_s21, %s410_s22  ;;  %s415_s27 = scalar_lea.hbm %s671_s0, 24 }
  0x1d   : > { %p416_p12 = scmp.lt.s32.totalorder %s409_s21, %s671_s0  ;;  %p417_p13 = scmp.lt.s32.totalorder %s415_s27, %s410_s22 }
  0x1e   : > { %p413_p10 = pnand %p412_p9, %p411_p2 }
  0x1f   : > { %p418_p3 = por %p417_p13, %p416_p12 }
  0x20   : > { %p414_p11 = pneg %p413_p10 }
  0x22   : > { %p419_p5 = pnand %p418_p3, %p414_p11 }
  0x24   : > { %422 = shalt.err (!%p419_p5)
}
  0x25   : > { %351 = dma.hbm_to_vmem [thread:$0]  (!%p609_p7), %s157_s10, 128, %s159_s12, %s147_s18  }
  0x26   : > { %167 = sbr.rel (%p577_p8) target bundleno = 71 (0x47), region = 32  ;;  %s626_s4 = sand.u32 (!%p577_p8), 1, %s500_s15  }
  0x27   : > { %s328_s6 = sshll.u32 (!%p577_p8), %s626_s4, 3  ;;  %s170_s7 = scalar_lea.sflag (!%p577_p8), [#allocation4], %s626_s4 }
  0x28   : > { %s173_s8 = scalar_lea.vmem (!%p577_p8), [#allocation3], %s328_s6 }
  0x2b   : > { %483 = dma.done.wait (%p564_p4), %s170_s7, 128  }
  0x2c   : > { %485 = vsyncadd (%p564_p4), %s170_s7, 4294967168 }
  0x2d   : > { %487 = dma.done.wait (%p42_p1), [#allocation6], 16  }
  0x2e   : > { %489 = vsyncadd (%p42_p1), [#allocation6], 4294967280 }
  0x2f   : > { %184 = sfence }
  0x30   : > { %s203_s24 = sld [smem:[#allocation7]]  ;;  %v202_v0 = vld [vmem:[%s173_s8] sm:$0x1]  ;;  %v206_v1 = vld [vmem:[%s173_s8 + $0x1] sm:$0x1]  ;;  %s239_s21 = scalar_lea.hbm %s674_s3, %s555_s2 }
  0x31   : > { %s330_s9 = sld [smem:[#allocation7 + $0x1]]  ;;  %v211_v3 = vld [vmem:[%s173_s8 + $0x2] sm:$0x1]  ;;  %v216_v6 = vld [vmem:[%s173_s8 + $0x3] sm:$0x1]  ;;  %s201_s22 = scalar_lea.vmem [#allocation8], %s626_s4 }
  0x32   : > { %s331_s10 = sld [smem:[#allocation7 + $0x2]]  ;;  %v221_v11 = vld [vmem:[%s173_s8 + $0x4] sm:$0x1]  ;;  %s241_s23 = sshll.u32 %s201_s22, 4  ;;  %s242_s23 = int_to_ptr.vmem [resolvable:$true] %s241_s23 }
  0x33   : > { %s332_s11 = sld [smem:[#allocation7 + $0x3]]  ;;  %s243_s26 = sshll.u32 %s239_s21, 4  ;;  %s244_s26 = int_to_ptr.hbm [resolvable:$true] %s243_s26 }
  0x34   : > { %s333_s12 = sld [smem:[#allocation7 + $0x4]]  ;;  %s231_s27 = scalar_lea.sflag [#allocation5], %s626_s4 }
  0x35   : > { %s226_s19 = sld [smem:[#allocation2]]  ;;  %s452_s28 = sshra.s32 %s244_s26, 4  ;;  %s453_s28 = int_to_ptr.hbm [resolvable:$true] %s452_s28 }
  0x36   : > { %v204_v2 = vstv %s203_s24  ;;  %s454_s5 = scalar_lea.hbm %s453_s28, 1  ;;  %s458_s7 = scalar_lea.hbm %s674_s3, 3 }
  0x37   : > { %v205_v4 = vmul.f32 %v204_v2, %v202_v0  ;;  %v208_v5 = vstv %s330_s9  ;;  %p455_p1 = scmp.ne.s32.totalorder %s453_s28, %s454_s5  ;;  %p459_p7 = scmp.lt.s32.totalorder %s453_s28, %s674_s3 }
  0x38   : > { %v209_v7 = vmul.f32 %v208_v5, %v206_v1  ;;  %v213_v8 = vstv %s331_s10  ;;  %p460_p2 = scmp.lt.s32.totalorder %s458_s7, %s454_s5 }
  0x39   : > { %v214_v9 = vmul.f32 %v213_v8, %v211_v3  ;;  %v218_v10 = vstv %s332_s11  ;;  %p456_p4 = pnand %p455_p1, %p599_p0 }
  0x3a   : > { %v210_v12 = vadd.f32 %v209_v7, %v205_v4  ;;  %v219_v13 = vmul.f32 %v218_v10, %v216_v6  ;;  %v223_v14 = vstv %s333_s12  ;;  %p461_p9 = por %p460_p2, %p459_p7 }
  0x3b   : > { %v224_v16 = vmul.f32 %v223_v14, %v221_v11  ;;  %v227_v18 = vstv %s226_s19  ;;  %p457_p8 = pneg %p456_p4 }
  0x3c   : > { %v215_v15 = vadd.f32 %v214_v9, %v210_v12 }
  0x3d   : > { %p462_p10 = pnand %p461_p9, %p457_p8 }
  0x3e   : > { %v220_v17 = vadd.f32 %v219_v13, %v215_v15 }
  0x40   : > { %v225_v19 = vadd.f32 %v224_v16, %v220_v17 }
  0x42   : > { %v228_v20 = vadd.f32 %v227_v18, %v225_v19 }
  0x44   : > { %229 = vst [vmem:[%s201_s22] sm:$0x1] %v228_v20 }
  0x45   : > { %465 = shalt.err (!%p462_p10)
}
  0x46   : > { %342 = dma.vmem_to_hbm [thread:$0]  (%p599_p0), %s242_s23, 16, %s244_s26, %s231_s27  }
  0x47 PF: > { %p359_p11 = scmp.ge.s32.totalorder %s508_s17, 2  ;;  %s255_s4 = sand.u32 1, %s496_s14  }
  0x48   : > { %s256_s9 = scalar_lea.sflag [#allocation5], %s255_s4 }
  0x49   : > { %p353_p12 = pnand %p359_p11, %p569_p6 }
  0x4b   : > { %p354_p13 = pneg %p353_p12 }
  0x4d   : > { %491 = dma.done.wait (%p354_p13), %s256_s9, 16  }
  0x4e   : > { %493 = vsyncadd (%p354_p13), %s256_s9, 4294967280  ;;  %p18_p3 = scmp.ge.s32.totalorder %s584_s25, 5   ;;  %s680_s14 = smov %s500_s15 }
  0x4f   : > { %s681_s15 = smov %s504_s16  ;;  %s682_s16 = smov %s594_s29 }
  0x50   : > { %s683_s17 = smov %s584_s25  ;;  %20 = sbr.rel (!%p18_p3) target bundleno = 8 (0x8), region = 82 }
  0x55   :  { %261 = vsyncpa [#allocation4], 1 }
  0x56   :  { %263 = vsyncpa [#allocation4 + $0x1], 1 }
  0x57   :  { %264 = vsyncpa [#allocation5], 1 }
  0x58   :  { %266 = vsyncpa [#allocation5 + $0x1], 1 }
  0x59   :  { %267 = vsyncpa [#allocation6], 1 }
  0x5a   :  { %269 = vsyncpa [#allocation6 + $0x1], 1 }

</bundles_post_ra>
